<compile_context>
chip_gen: v7x
topology: tpu7x:2x2x1
jax: 0.10.0
libtpu: 0.0.40
codegen_flags: <defaults>
</compile_context>

<pallas_src>
import jax
import jax.numpy as jnp
from jax.experimental import pallas as pl
from jax.experimental.pallas import tpu as pltpu


def gcn_kernel(a_ref, x_ref, wt_ref, o_ref):
    a = a_ref[...]                                                   # (N, N)
    x = x_ref[0]                                                     # (N, F_in)
    ax = jnp.dot(a, x, preferred_element_type=jnp.float32)           # (N, F_in)
    y = jnp.dot(ax, wt_ref[...], preferred_element_type=jnp.float32) # (N, F_out)
    o_ref[0] = jnp.maximum(y, 0.0).astype(o_ref.dtype)               # ReLU


def gcn_forward(x, adj, weight):
    """
    x:      (B, N, F_in)
    adj:    (N, N)          symmetrically-normalized adjacency
    weight: (F_out, F_in)   Theta.weight (PyTorch nn.Linear layout)
    returns (B, N, F_out) = relu( (adj @ x) @ weight.T )
    """
    B, N, F_in = x.shape
    F_out = weight.shape[0]
    w_t = weight.T                     # one-time weight-layout change on host

    return pl.pallas_call(
        gcn_kernel,
        out_shape=jax.ShapeDtypeStruct((B, N, F_out), x.dtype),
        grid_spec=pltpu.PrefetchScalarGridSpec(
            num_scalar_prefetch=0,
            grid=(B,),
            in_specs=[
                pl.BlockSpec((N, N), lambda b: (0, 0)),          # A, shared
                pl.BlockSpec((1, N, F_in), lambda b: (b, 0, 0)), # x[b]
                pl.BlockSpec((F_in, F_out), lambda b: (0, 0)),   # W^T, shared
            ],
            out_specs=pl.BlockSpec((1, N, F_out), lambda b: (b, 0, 0)),
        ),
        compiler_params=pltpu.CompilerParams(
            dimension_semantics=("parallel",),
        ),
    )(adj, x, w_t)


if __name__ == "__main__":
    # Small shapes consistent with GCN.forward: x (B, N, F_in) -> (B, N, F_out).
    # F_out = 128 keeps the output store lane-dense (full 128-lane vregs).
    B, N, F_IN, F_OUT = 2, 16, 32, 128

    key = jax.random.PRNGKey(0)
    kx, ka, kw = jax.random.split(key, 3)

    x = jax.random.normal(kx, (B, N, F_IN), dtype=jnp.float32)

    # Symmetrically-normalized adjacency: D^{-1/2} (A + I) D^{-1/2}
    a_raw = (jax.random.uniform(ka, (N, N), dtype=jnp.float32) > 0.5).astype(jnp.float32)
    a_raw = jnp.maximum(a_raw, a_raw.T) + jnp.eye(N, dtype=jnp.float32)
    d_inv_sqrt = 1.0 / jnp.sqrt(jnp.sum(a_raw, axis=-1))
    adj = a_raw * d_inv_sqrt[:, None] * d_inv_sqrt[None, :]

    # Theta: nn.Linear(F_IN, F_OUT, bias=False).weight has shape (F_OUT, F_IN).
    weight = jax.random.normal(kw, (F_OUT, F_IN), dtype=jnp.float32) / jnp.sqrt(F_IN)

    out = gcn_forward(x, adj, weight)
    jax.block_until_ready(out)

    # Pure-JAX reference (loose tolerance: TPU MXU f32 matmul precision differs
    # from XLA's default f32 matmul path).
    ref = jnp.maximum(jnp.einsum("ij,bjf->bif", adj, x) @ weight.T, 0.0)
    assert out.shape == (B, N, F_OUT)
    assert jnp.allclose(out, ref, atol=1e-2, rtol=1e-2)
    print("KERNEL_OK")
</pallas_src>

<mosaic_0001>
module attributes {stable_mosaic.version = 11 : i64} {
  func.func @gcn_kernel(%arg0: i32, %arg1: memref<16x16xf32, #tpu.memory_space<vmem>>, %arg2: memref<1x16x32xf32, #tpu.memory_space<vmem>>, %arg3: memref<32x128xf32, #tpu.memory_space<vmem>>, %arg4: memref<1x16x128xf32, #tpu.memory_space<vmem>>) attributes {dimension_semantics = [#tpu.dimension_semantics<parallel>], iteration_bounds = array<i64: 2>, scalar_prefetch = 0 : i64, scratch_operands = 0 : i64, tpu.core_type = #tpu.core_type<tc>, window_params = [{pipeline_mode = #tpu.pipeline_mode<synchronous>, transform_indices = @transform_0, window_bounds = array<i64: 16, 16>}, {transform_indices = @transform_1, window_bounds = array<i64: 1, 16, 32>}, {pipeline_mode = #tpu.pipeline_mode<synchronous>, transform_indices = @transform_2, window_bounds = array<i64: 32, 128>}, {transform_indices = @transform_3, window_bounds = array<i64: 1, 16, 128>}]} {
    %c0 = arith.constant 0 : index
    %c0_0 = arith.constant 0 : index
    %0 = vector.load %arg1[%c0, %c0_0] : memref<16x16xf32, #tpu.memory_space<vmem>>, vector<16x16xf32>
    %c0_1 = arith.constant 0 : index
    %c0_2 = arith.constant 0 : index
    %c0_3 = arith.constant 0 : index
    %1 = vector.load %arg2[%c0_1, %c0_2, %c0_3] : memref<1x16x32xf32, #tpu.memory_space<vmem>>, vector<1x16x32xf32>
    %2 = vector.shape_cast %1 : vector<1x16x32xf32> to vector<16x32xf32>
    %cst = arith.constant dense<0.000000e+00> : vector<16x32xf32>
    %3 = tpu.matmul %0, %2, %cst {dimension_numbers = #tpu.dot_dimension_numbers<[1], [0], [0], [1], [0, 0, 1, 1], [], []>} : vector<16x16xf32>, vector<16x32xf32>, vector<16x32xf32> -> vector<16x32xf32>
    %c0_4 = arith.constant 0 : index
    %c0_5 = arith.constant 0 : index
    %4 = vector.load %arg3[%c0_4, %c0_5] : memref<32x128xf32, #tpu.memory_space<vmem>>, vector<32x128xf32>
    %cst_6 = arith.constant dense<0.000000e+00> : vector<16x128xf32>
    %5 = tpu.matmul %3, %4, %cst_6 {dimension_numbers = #tpu.dot_dimension_numbers<[1], [0], [0], [1], [0, 0, 1, 1], [], []>} : vector<16x32xf32>, vector<32x128xf32>, vector<16x128xf32> -> vector<16x128xf32>
    %cst_7 = arith.constant 0.000000e+00 : f32
    %6 = vector.broadcast %cst_7 : f32 to vector<16x128xf32>
    %7 = arith.maximumf %5, %6 : vector<16x128xf32>
    %c0_8 = arith.constant 0 : index
    %c0_9 = arith.constant 0 : index
    %c0_10 = arith.constant 0 : index
    %8 = vector.load %arg4[%c0_8, %c0_9, %c0_10] : memref<1x16x128xf32, #tpu.memory_space<vmem>>, vector<1x16x128xf32>
    %9 = vector.shape_cast %8 : vector<1x16x128xf32> to vector<16x128xf32>
    %10 = vector.shape_cast %7 : vector<16x128xf32> to vector<1x16x128xf32>
    tpu.vector_store %arg4[%c0_8, %c0_9, %c0_10], %10 {strides = array<i32>} : memref<1x16x128xf32, #tpu.memory_space<vmem>>, vector<1x16x128xf32>,
    return
  }
  func.func @transform_0(%arg0: i32) -> (i32, i32) {
    %c0_i32 = arith.constant 0 : i32
    %c0_i32_0 = arith.constant 0 : i32
    %c0_i32_1 = arith.constant 0 : i32
    return %c0_i32, %c0_i32_0 : i32, i32
  }
  func.func @transform_1(%arg0: i32) -> (i32, i32, i32) {
    %c0_i32 = arith.constant 0 : i32
    %c0_i32_0 = arith.constant 0 : i32
    %c0_i32_1 = arith.constant 0 : i32
    return %arg0, %c0_i32, %c0_i32_0 : i32, i32, i32
  }
  func.func @transform_2(%arg0: i32) -> (i32, i32) {
    %c0_i32 = arith.constant 0 : i32
    %c0_i32_0 = arith.constant 0 : i32
    %c0_i32_1 = arith.constant 0 : i32
    return %c0_i32, %c0_i32_0 : i32, i32
  }
  func.func @transform_3(%arg0: i32) -> (i32, i32, i32) {
    %c0_i32 = arith.constant 0 : i32
    %c0_i32_0 = arith.constant 0 : i32
    %c0_i32_1 = arith.constant 0 : i32
    return %arg0, %c0_i32, %c0_i32_0 : i32, i32, i32
  }
}

</mosaic_0001>

<bundles_post_ra>
// kernel: tpu_custom_call.1
= control target key start
LH: loop header
LB: loop body
LE: loop exit
PB: predicated region body
PF: predicated region fallthrough
CT: control target
= control target key end

     0   :  { %8 = vsyncpa [#allocation3], 0  ;;  %s1074_s0 = inlined_call_operand.hbm [shape: f32[16,16], index: 0, kind: input, shape index: {}]   ;;  %s1075_s1 = inlined_call_operand.hbm [shape: f32[2,16,32], index: 1, kind: input, shape index: {}]   ;;  %s1076_s2 = inlined_call_operand.hbm [shape: f32[32,128], index: 2, kind: input, shape index: {}]   ;;  %s1077_s3 = inlined_call_operand.hbm [shape: f32[2,16,128], index: 3, kind: output, shape index: {}]  }
   0x1   :  { %9 = vsyncpa [#allocation6], 0 }
   0x2   :  { %11 = vsyncpa [#allocation6 + $0x1], 0 }
   0x3   :  { %12 = vsyncpa [#allocation4], 0 }
   0x4   :  { %14 = vsyncpa [#allocation4 + $0x1], 0  ;;  %s827_s12 = smov 0   ;;  %s829_s13 = smov 0  }
   0x5   :  { %s831_s14 = smov 0   ;;  %s833_s15 = smov 0  }
   0x6 LB: > { %s848_s16 = sadd.s32 4294967295, %s797_s15   ;;  %s502_s17 = sadd.s32 4294967294, %s797_s15   ;;  %s797_s15 = sphi %s833_s15, %s1105_s15   ;;  %s793_s14 = sphi %s831_s14, %s1104_s14   ;;  %s789_s13 = sphi %s829_s13, %s1103_s13   ;;  %s785_s12 = sphi %s827_s12, %s1102_s12  }
   0x7   : > { %s852_s18 = sadd.s32 1, %s797_s15   ;;  %s48_s19 = sadd.s32 1, %s793_s14 }
   0x8   : > { %s45_s20 = ssub.s32 %s797_s15, %s852_s18  ;;  %p55_p0 = scmp.ne.s32.totalorder %s793_s14, %s789_s13 }
   0x9   : > { %p46_p1 = scmp.eq.s32.totalorder %s45_s20, 0  ;;  %p56_p2 = scmp.eq.s32.totalorder %s797_s15, 0 }
   0xa   : > { %p61_p3 = scmp.ne.s32.totalorder %s789_s13, %s785_s12  ;;  %p1079_p4 = scmp.eq.s32.totalorder %s848_s16, 0 }
   0xb   : > { %s864_s21 = scalar_select %p46_p1, %s793_s14, %s48_s19  }
   0xc   : > { %p866_p5 = por %p56_p2, %p55_p0  ;;  %p872_p6 = por %p1079_p4, %p61_p3 }
   0xd   : > { %p106_p7 = scmp.eq.s32.totalorder %s848_s16, 1  ;;  %p112_p8 = scmp.eq.s32.totalorder %s502_s17, 1 }
   0xe   : > { %s1083_s22 = scalar_select %p866_p5, 1, 0 }
   0xf   : > { %s1084_s23 = scalar_select %p872_p6, 1, 0 }
  0x10   : > { %p503_p9 = scmp.ge.s32.totalorder %s797_s15, 1  ;;  %p119_p10 = scmp.lt.s32.totalorder %s797_s15, 3 }
  0x11   : > { %p879_p11 = por %p106_p7, %p55_p0  ;;  %p883_p12 = por %p112_p8, %p61_p3 }
  0x12   : > { %p887_p13 = pnand %p503_p9, %p119_p10  ;;  %s799_s27 = smov [#allocation7]  }
  0x13   : > { %s1085_s24 = scalar_select %p879_p11, 1, 0 }
  0x14   : > { %s1086_s25 = scalar_select %p883_p12, 1, 0 }
  0x15   : > { %s1087_s26 = scalar_select %p887_p13, 1, 0 }
  0x16   : > { %p578_p1 = pneg %p887_p13  ;;  %s144_s28 = sshll.u32 %s799_s27, 4  ;;  %s145_s28 = int_to_ptr.vmem [resolvable:$true] %s144_s28 }
  0x17   : > { %s800_s30 = smov [#allocation2]   ;;  %s637_s7 = scalar_lea.hbm %s1076_s2, 512 }
  0x18   : > { %p896_p6 = pnand %p578_p1, %p1079_p4  ;;  %s131_s4 = sshll.u32 %s800_s30, 4  ;;  %s132_s4 = int_to_ptr.vmem [resolvable:$true] %s131_s4 }
  0x19   : > { %p638_p3 = scmp.ne.s32.totalorder %s1076_s2, %s637_s7  ;;  %p644_p10 = scmp.lt.u32.totalorder %s637_s7, %s1076_s2 }
  0x1a   : > { %p639_p7 = pneg %p896_p6 }
  0x1c   : > { %p640_p8 = pnand %p639_p7, %p638_p3 }
  0x1e   : > { %p641_p9 = pneg %p640_p8 }
  0x20   : > { %p646_p1 = pnand %p644_p10, %p641_p9 }
  0x22   : > { %649 = shalt.err (!%p646_p1)
}
  0x23   : > { %s650_s17 = scalar_lea.vmem %s145_s28, 512  ;;  %p658_p12 = scmp.lt.s32.totalorder %s145_s28, %s145_s28 }
  0x24   : > { %p651_p2 = scmp.ne.s32.totalorder %s145_s28, %s650_s17  ;;  %p659_p11 = scmp.lt.s32.totalorder %s650_s17, %s650_s17 }
  0x26   : > { %p653_p4 = pnand %p651_p2, %p639_p7  ;;  %p660_p13 = por %p659_p11, %p658_p12 }
  0x28   : > { %p654_p0 = pneg %p653_p4 }
  0x2a   : > { %p661_p5 = pnand %p660_p13, %p654_p0 }
  0x2c   : > { %664 = shalt.err (!%p661_p5)
}
  0x2d   : > { %s801_s19 = smov 128   ;;  %s802_s20 = smov 8  }
  0x2e   : > { %584 = dma.hbm_to_vmem [thread:$0]  (!%p896_p6), %s1076_s2, 512, %s145_s28, [#allocation6], %s801_s19, %s801_s19, %s802_s20  }
  0x2f   : > { %p1089_p4 = scmp.ne.s32.totalorder %s1083_s22, 0  ;;  %p1090_p2 = scmp.lt.s32.totalorder %s797_s15, 2 }
  0x30   : > { %s665_s8 = scalar_lea.hbm %s1074_s0, 256 }
  0x31   : > { %p930_p3 = pnand %p1090_p2, %p1089_p4  ;;  %p666_p5 = scmp.ne.s32.totalorder %s1074_s0, %s665_s8 }
  0x32   : > { %p672_p13 = scmp.lt.u32.totalorder %s665_s8, %s1074_s0 }
  0x33   : > { %s1091_s5 = scalar_select %p930_p3, 1, 0 }
  0x34   : > { %p668_p11 = pnand %p666_p5, %p639_p7 }
  0x36   : > { %p669_p12 = pneg %p668_p11 }
  0x38   : > { %p674_p0 = pnand %p672_p13, %p669_p12 }
  0x3a   : > { %677 = shalt.err (!%p674_p0)
}
  0x3b   : > { %s678_s11 = scalar_lea.vmem %s132_s4, 256  ;;  %p686_p1 = scmp.lt.s32.totalorder %s132_s4, %s132_s4 }
  0x3c   : > { %p679_p8 = scmp.ne.s32.totalorder %s132_s4, %s678_s11  ;;  %p687_p4 = scmp.lt.s32.totalorder %s678_s11, %s678_s11 }
  0x3e   : > { %p681_p9 = pnand %p679_p8, %p639_p7  ;;  %p688_p2 = por %p687_p4, %p686_p1 }
  0x40   : > { %p682_p10 = pneg %p681_p9 }
  0x42   : > { %p689_p3 = pnand %p688_p2, %p682_p10 }
  0x44   : > { %692 = shalt.err (!%p689_p3)
}
  0x45   : > { %581 = dma.hbm_to_vmem [thread:$0]  (!%p896_p6), %s1074_s0, 256, %s132_s4, [#allocation3], %s801_s19, %s801_s19, %s802_s20  }
  0x46   : > { %s158_s30 = sand.u32 1, %s797_s15   ;;  %s160_s6 = sand.u32 1, %s793_s14  }
  0x47   : > { %s507_s7 = sshll.u32 %s160_s6, 4  ;;  %s524_s8 = sshll.u32 %s797_s15, 8 }
  0x48   : > { %s963_s29 = scalar_lea.hbm %s1075_s1, %s524_s8  ;;  %s162_s28 = scalar_lea.vmem [#allocation5], %s507_s7 }
  0x49   : > { %s169_s22 = sshll.u32 %s162_s28, 4  ;;  %s967_s11 = scalar_lea.sflag [#allocation6], %s158_s30  ;;  %s965_s22 = int_to_ptr.vmem [resolvable:$true] %s169_s22 }
  0x4a   : > { %s693_s4 = scalar_lea.hbm %s963_s29, 256  ;;  %p1092_p7 = scmp.ne.s32.totalorder %s1091_s5, 0 }
  0x4b   : > { %p694_p6 = scmp.ne.s32.totalorder %s963_s29, %s693_s4  ;;  %s698_s6 = scalar_lea.hbm %s1075_s1, 512 }
  0x4c   : > { %p695_p3 = pneg %p1092_p7  ;;  %p699_p12 = scmp.lt.u32.totalorder %s963_s29, %s1075_s1 }
  0x4d   : > { %p700_p13 = scmp.lt.u32.totalorder %s698_s6, %s693_s4  ;;  %p702_p8 = scmp.lt.u32.totalorder %s693_s4, %s963_s29 }
  0x4e   : > { %p696_p5 = pnand %p695_p3, %p694_p6 }
  0x4f   : > { %p701_p0 = por %p700_p13, %p699_p12 }
  0x50   : > { %p697_p11 = pneg %p696_p5 }
  0x51   : > { %p703_p9 = por %p702_p8, %p701_p0 }
  0x53   : > { %p704_p10 = pnand %p703_p9, %p697_p11 }
  0x55   : > { %707 = shalt.err (!%p704_p10)
}
  0x56   : > { %s708_s30 = scalar_lea.vmem %s965_s22, 256  ;;  %s803_s7 = smov [#allocation5]  }
  0x57   : > { %p709_p1 = scmp.ne.s32.totalorder %s965_s22, %s708_s30  ;;  %s713_s10 = sshll.u32 %s803_s7, 4  ;;  %s714_s10 = int_to_ptr.vmem [resolvable:$false] %s713_s10 }
  0x58   : > { %s715_s28 = scalar_lea.vmem %s714_s10, 512  ;;  %p716_p6 = scmp.lt.s32.totalorder %s965_s22, %s714_s10 }
  0x59   : > { %p711_p4 = pnand %p709_p1, %p695_p3  ;;  %p717_p5 = scmp.lt.s32.totalorder %s715_s28, %s708_s30 }
  0x5b   : > { %p712_p2 = pneg %p711_p4  ;;  %p718_p12 = por %p717_p5, %p716_p6 }
  0x5d   : > { %p719_p13 = pnand %p718_p12, %p712_p2 }
  0x5f   : > { %722 = shalt.err (!%p719_p13)
}
  0x60   : > { %588 = dma.hbm_to_vmem [thread:$0]  (!%p1092_p7), %s963_s29, 256, %s965_s22, %s967_s11, %s801_s19, %s801_s19, %s802_s20  }
  0x61   : > { %p1093_p3 = scmp.ne.s32.totalorder %s1087_s26, 0 }
  0x62   : > { %p1094_p11 = scmp.eq.s32.totalorder (!%p1093_p3), %s848_s16, 0 }
  0x63   : > { %181 = sbr.rel (%p1093_p3) target bundleno = 566 (0x236), region = 32 }
  0x6a   : > { %768 = dma.done.wait (%p1094_p11), [#allocation3], 256   ;;  %p1095_p0 = pmov %p1094_p11 }
  0x6b   : > { %s187_s5 = sand.u32 1, %s848_s16   ;;  %s189_s4 = sand.u32 1, %s789_s13  }
  0x6c   : > { %770 = vsyncadd (%p1095_p0), [#allocation3], 4294967040  ;;  %s1008_s17 = sshll.u32 %s189_s4, 4  ;;  %s188_s19 = scalar_lea.sflag [#allocation6], %s187_s5 }
  0x6d   : > { %s191_s20 = scalar_lea.vmem [#allocation5], %s1008_s17  ;;  %p1096_p7 = scmp.ne.s32.totalorder %s1084_s23, 0 }
  0x6f   : > { %772 = dma.done.wait (%p1096_p7), %s188_s19, 256  }
  0x70   : > { %774 = vsyncadd (%p1096_p7), %s188_s19, 4294967040  ;;  %p1097_p8 = pmov %p1095_p0 }
  0x71   : > { %p1098_p9 = pmov %p1095_p0 }
  0x72   : > { %776 = dma.done.wait (%p1097_p8), [#allocation6], 512  }
  0x73   : > { %778 = vsyncadd (%p1098_p9), [#allocation6], 4294966784  ;;  %vm222_vm0 = vcmask 130048   ;;  %v220_v0 = vld [vmem:[%s191_s20] sm:$0xff]  ;;  %v221_v1 = vld [vmem:[%s191_s20 + $0x8] sm:$0xff]  ;;  %vm308_vm1 = vcmask 261120  }
  0x74   : > { %v218_v2 = vld [vmem:[#allocation2] sm:$0xff]  ;;  %v554_v3 = vpack.c.bf16 %v221_v1, %v220_v0  ;;  %v304_v4 = vld [vmem:[#allocation7] sm:$0xff]  ;;  %v305_v5 = vld [vmem:[#allocation7 + $0x8] sm:$0xff]  ;;  %s217_s23 = scalar_lea.vmem [#allocation8], %s1008_s17  ;;  %s525_s29 = sshll.u32 %s848_s16, 8 }
  0x75   : > { %540 = vmatprep.mubr.msk.f32.mxu0 %vm222_vm0, %v218_v2  ;;  %v558_v6 = vpack.c.bf16 %v305_v5, %v304_v4  ;;  %v306_v7 = vld [vmem:[#allocation7 + $0x10] sm:$0xff]  ;;  %v307_v8 = vld [vmem:[#allocation7 + $0x18] sm:$0xff]  ;;  %s408_s26 = sshll.u32 %s217_s23, 4  ;;  %s1028_s27 = scalar_lea.hbm %s1077_s3, %s525_s29  ;;  %s1023_s26 = int_to_ptr.vmem [resolvable:$true] %s408_s26 }
  0x76   : > { %555 = vmatprep.subr.bf16.mxu0 %v554_v3  ;;  %v562_v9 = vpack.c.bf16 %v307_v8, %v306_v7  ;;  %v219_v10 = vld [vmem:[#allocation2 + $0x8] sm:$0xff]  ;;  %s1032_s6 = scalar_lea.sflag [#allocation4], %s189_s4  ;;  %s723_s16 = scalar_lea.vmem %s1023_s26, 256 }
  0x77   : > { %557 = vmatpush3.bf16.msra.mxu0 %v554_v3  ;;  %559 = vmatprep.subr.bf16.mxu1 %v558_v6  ;;  %p724_p10 = scmp.ne.s32.totalorder %s1023_s26, %s723_s16  ;;  %p1099_p1 = scmp.ne.s32.totalorder %s1085_s24, 0 }
  0x78   : > { %561 = vmatpush3.bf16.msra.mxu1 %v558_v6  ;;  %s804_s8 = smov [#allocation8]  }
  0x79   : > { %563 = vmatprep.subr.bf16.mxu1 %v562_v9  ;;  %p725_p4 = pnand %p724_p10, %p1099_p1  ;;  %s727_s9 = sshll.u32 %s804_s8, 4  ;;  %s728_s9 = int_to_ptr.vmem [resolvable:$false] %s727_s9 }
  0x7a   : > { %541 = vmatmul.mubr.msk.f32.vlgmr.msra.gmra.mrb[0].mxu0 %vm222_vm0, %v219_v10  ;;  %s729_s30 = scalar_lea.vmem %s728_s9, 512  ;;  %p730_p6 = scmp.lt.s32.totalorder %s1023_s26, %s728_s9 }
  0x7b   : > { %p726_p2 = pneg %p725_p4  ;;  %p731_p5 = scmp.lt.s32.totalorder %s729_s30, %s723_s16 }
  0x7c   : > { %565 = vmatpush3.bf16.msra.mxu1 %v562_v9 }
  0x7d   : > { %p732_p12 = por %p731_p5, %p730_p6 }
  0x7f   : > { %p733_p13 = pnand %p732_p12, %p726_p2 }
 0x14d   : > { %v542_v11 = vpop.f32.mrb[0].mxu0 }
 0x14e   : > { %v295_v12 = vpop.f32.mrb[1].mxu0 }
 0x14f   : > { %551 = vmatprep.mubr.msk.f32.mxu1 %vm308_vm1, %v295_v12 }
 0x150   : > { %552 = vmatmul.mubr.msk.f32.vlgmr.msra.gmra.mrb[0].mxu1 %vm308_vm1, %v542_v11 }
 0x223   : > { %v553_v13 = vpop.f32.mrb[0].mxu1 }
 0x224   : > { %v391_v14 = vmax.f32 %v553_v13, 0.0  ;;  %v381_v15 = vpop.f32.mrb[1].mxu1 }
 0x225   : > { %v390_v16 = vmax.f32 %v381_v15, 0.0 }
 0x226   : > { %393 = vst [vmem:[%s217_s23 + $0x8] sm:$0xff] %v391_v14 }
 0x227   : > { %392 = vst [vmem:[%s217_s23] sm:$0xff] %v390_v16 }
 0x228   : > { %736 = shalt.err (!%p733_p13)
}
 0x229   : > { %s737_s7 = scalar_lea.hbm %s1028_s27, 256  ;;  %s741_s5 = scalar_lea.hbm %s1077_s3, 512 }
 0x22a   : > { %p738_p3 = scmp.ne.s32.totalorder %s1028_s27, %s737_s7  ;;  %p742_p7 = scmp.lt.u32.totalorder %s1028_s27, %s1077_s3 }
 0x22b   : > { %p743_p8 = scmp.lt.u32.totalorder %s741_s5, %s737_s7  ;;  %p745_p10 = scmp.lt.u32.totalorder %s737_s7, %s1028_s27 }
 0x22c   : > { %p739_p11 = pnand %p738_p3, %p1099_p1 }
 0x22d   : > { %p744_p9 = por %p743_p8, %p742_p7 }
 0x22e   : > { %p740_p0 = pneg %p739_p11 }
 0x22f   : > { %p746_p4 = por %p745_p10, %p744_p9 }
 0x231   : > { %p747_p2 = pnand %p746_p4, %p740_p0 }
 0x233   : > { %750 = shalt.err (!%p747_p2)
}
 0x234   : > { %s805_s19 = smov 128   ;;  %s806_s20 = smov 8  }
 0x235   : > { %576 = dma.vmem_to_hbm [thread:$0]  (%p1099_p1), %s1023_s26, 256, %s1028_s27, %s1032_s6, %s805_s19, %s805_s19, %s806_s20  }
 0x236 PF: > { %s423_s23 = sand.u32 1, %s785_s12   ;;  %p1100_p6 = scmp.ne.s32.totalorder %s1086_s25, 0 }
 0x237   : > { %p1101_p5 = scmp.ge.s32.totalorder %s797_s15, 2  ;;  %s424_s29 = scalar_lea.sflag [#allocation4], %s423_s23 }
 0x239   : > { %p590_p12 = pnand %p1101_p5, %p1100_p6 }
 0x23b   : > { %780 = dma.done.wait (!%p590_p12), %s424_s29, 256  }
 0x23c   : > { %782 = vsyncadd (!%p590_p12), %s424_s29, 4294967040  ;;  %p17_p13 = scmp.ge.s32.totalorder %s852_s18, 4   ;;  %s1102_s12 = smov %s789_s13 }
 0x23d   : > { %s1103_s13 = smov %s793_s14  ;;  %s1104_s14 = smov %s864_s21 }
 0x23e   : > { %s1105_s15 = smov %s852_s18  ;;  %19 = sbr.rel (!%p17_p13) target bundleno = 6 (0x6), region = 86 }
 0x245   :  { %429 = vsyncpa [#allocation3], 1 }
 0x246   :  { %431 = vsyncpa [#allocation3 + $0x1], 1 }
 0x247   :  { %432 = vsyncpa [#allocation6], 1 }
 0x248   :  { %434 = vsyncpa [#allocation6 + $0x1], 1 }
 0x249   :  { %435 = vsyncpa [#allocation4], 1 }
 0x24a   :  { %437 = vsyncpa [#allocation4 + $0x1], 1 }

</bundles_post_ra>
